<compile_context>
chip_gen: v5e
topology: v5e:2x2
jax: 0.10.0
libtpu: 0.0.40
codegen_flags: <defaults>
</compile_context>

<pallas_src>
import functools
import math

import jax
import jax.numpy as jnp
from jax.experimental import pallas as pl
from jax.experimental.pallas import tpu as pltpu


def _zero_pad_kernel(x_ref, o_ref, *, ncin, ncout):
    # Copy x into the first `ncin` channels, zeros into the rest.
    # (No full-tile zero followed by overwrite: every byte is stored once.)
    bt, _, hw = o_ref.shape
    o_ref[:, :ncin, :] = x_ref[...].astype(o_ref.dtype)
    if ncout > ncin:  # static Python branch at trace time
        o_ref[:, ncin:, :] = jnp.zeros((bt, ncout - ncin, hw), o_ref.dtype)


def _clone_kernel(x_ref, o_ref, *, rep):
    # Scale once (on ncin channels), tile along the channel (sublane) axis,
    # single full-ref store.
    scale = 1.0 / math.sqrt(rep)
    x = x_ref[...].astype(o_ref.dtype) * scale
    if rep == 1:
        o_ref[...] = x
    else:
        o_ref[...] = jnp.tile(x, (1, rep, 1))


def _choose_batch_tile(bs, out_slab_bytes, target_bytes=4 << 20):
    """Largest divisor of bs whose output tile stays <= target_bytes.

    Prefers keeping >= 2 grid steps (v7x has 2 TensorCores; batch axis is
    'parallel'), falling back to a single step only when bs forces it.
    """
    divisors = [d for d in range(1, bs + 1) if bs % d == 0]
    fitting = [d for d in divisors if d * out_slab_bytes <= target_bytes] or [1]
    multi = [d for d in fitting if bs // d >= 2]
    return max(multi) if multi else max(fitting)


def padding_channels(x, ncout, ncin=3, mode="zero", out_dtype=None):
    """Pallas implementation of PaddingChannels.forward (NCHW layout).

    out_dtype: only used for mode='zero'.  Defaults to float32 for strict
    torch.zeros parity; pass x.dtype to halve write traffic for bf16 inputs.
    """
    bs, c, h, w = x.shape
    assert c == ncin, f"expected {ncin} input channels, got {c}"
    hw = h * w

    if mode == "zero":
        assert ncout >= ncin, "zero mode requires ncout >= ncin"
        c_out = ncout
        out_dt = jnp.float32 if out_dtype is None else out_dtype
        kernel = functools.partial(_zero_pad_kernel, ncin=ncin, ncout=ncout)
    elif mode == "clone":
        rep = int(ncout / ncin)  # torch semantics: truncating division
        assert rep >= 1, "clone mode requires ncout >= ncin"
        c_out = ncin * rep       # matches x.repeat(1, rep, 1, 1) exactly
        out_dt = x.dtype
        kernel = functools.partial(_clone_kernel, rep=rep)
    else:
        raise ValueError(f"unknown mode: {mode}")

    # Flatten spatial dims so the last (lane) dim is H*W — lane-dense stores,
    # channels fill the sublane dim.
    x2 = x.reshape(bs, ncin, hw)

    out_slab_bytes = c_out * hw * jnp.dtype(out_dt).itemsize
    bt = _choose_batch_tile(bs, out_slab_bytes)

    out2 = pl.pallas_call(
        kernel,
        out_shape=jax.ShapeDtypeStruct((bs, c_out, hw), out_dt),
        grid=(bs // bt,),
        in_specs=[pl.BlockSpec((bt, ncin, hw), lambda b: (b, 0, 0))],
        out_specs=pl.BlockSpec((bt, c_out, hw), lambda b: (b, 0, 0)),
        compiler_params=pltpu.CompilerParams(
            dimension_semantics=("parallel",),
        ),
    )(x2)

    return out2.reshape(bs, c_out, h, w)


if __name__ == "__main__":
    key = jax.random.PRNGKey(0)
    bs, ncin, h, w = 2, 4, 16, 16
    ncout = 16

    x = jax.random.normal(key, (bs, ncin, h, w), dtype=jnp.float32)

    # --- mode='zero' (the module default) ---
    out_zero = jax.block_until_ready(padding_channels(x, ncout, ncin=ncin, mode="zero"))
    ref_zero = jnp.zeros((bs, ncout, h, w), jnp.float32).at[:, :ncin].set(x)
    assert out_zero.shape == (bs, ncout, h, w)
    assert out_zero.dtype == jnp.float32
    assert jnp.allclose(out_zero, ref_zero), "zero-mode mismatch"

    # --- mode='clone' ---
    rep = ncout // ncin
    out_clone = jax.block_until_ready(padding_channels(x, ncout, ncin=ncin, mode="clone"))
    ref_clone = jnp.tile(x, (1, rep, 1, 1)) / jnp.sqrt(jnp.float32(rep))
    assert out_clone.shape == (bs, ncout, h, w)
    assert out_clone.dtype == x.dtype
    assert jnp.allclose(out_clone, ref_clone, atol=1e-6), "clone-mode mismatch"

    # --- mode='clone', non-divisible ncout (torch truncating semantics) ---
    out_clone_nd = jax.block_until_ready(padding_channels(x, 10, ncin=ncin, mode="clone"))
    ref_clone_nd = jnp.tile(x, (1, 2, 1, 1)) / jnp.sqrt(jnp.float32(2))
    assert out_clone_nd.shape == (bs, 8, h, w)  # ncin * int(10/4) channels, like torch
    assert jnp.allclose(out_clone_nd, ref_clone_nd, atol=1e-6), "clone-nd mismatch"

    print("KERNEL_OK")
</pallas_src>

<mosaic_0001>
module attributes {stable_mosaic.version = 11 : i64} {
  func.func @_zero_pad_kernel(%arg0: i32, %arg1: memref<1x4x256xf32, #tpu.memory_space<vmem>>, %arg2: memref<1x16x256xf32, #tpu.memory_space<vmem>>) attributes {dimension_semantics = [#tpu.dimension_semantics<parallel>], iteration_bounds = array<i64: 2>, scalar_prefetch = 0 : i64, scratch_operands = 0 : i64, tpu.core_type = #tpu.core_type<tc>, window_params = [{transform_indices = @transform_0, window_bounds = array<i64: 1, 4, 256>}, {transform_indices = @transform_1, window_bounds = array<i64: 1, 16, 256>}]} {
    %c0 = arith.constant 0 : index
    %c0_0 = arith.constant 0 : index
    %c0_1 = arith.constant 0 : index
    %0 = vector.load %arg1[%c0, %c0_0, %c0_1] : memref<1x4x256xf32, #tpu.memory_space<vmem>>, vector<1x4x256xf32>
    %c0_2 = arith.constant 0 : index
    %c0_3 = arith.constant 0 : index
    %c0_4 = arith.constant 0 : index
    %1 = vector.load %arg2[%c0_2, %c0_3, %c0_4] : memref<1x16x256xf32, #tpu.memory_space<vmem>>, vector<1x4x256xf32>
    tpu.vector_store %arg2[%c0_2, %c0_3, %c0_4], %0 {strides = array<i32>} : memref<1x16x256xf32, #tpu.memory_space<vmem>>, vector<1x4x256xf32>,
    %cst = arith.constant 0.000000e+00 : f32
    %2 = vector.broadcast %cst : f32 to vector<1x12x256xf32>
    %c0_5 = arith.constant 0 : index
    %c4 = arith.constant 4 : index
    %c0_6 = arith.constant 0 : index
    %3 = vector.load %arg2[%c0_5, %c4, %c0_6] : memref<1x16x256xf32, #tpu.memory_space<vmem>>, vector<1x12x256xf32>
    tpu.vector_store %arg2[%c0_5, %c4, %c0_6], %2 {strides = array<i32>} : memref<1x16x256xf32, #tpu.memory_space<vmem>>, vector<1x12x256xf32>,
    return
  }
  func.func @transform_0(%arg0: i32) -> (i32, i32, i32) {
    %c0_i32 = arith.constant 0 : i32
    %c0_i32_0 = arith.constant 0 : i32
    %c0_i32_1 = arith.constant 0 : i32
    return %arg0, %c0_i32, %c0_i32_0 : i32, i32, i32
  }
  func.func @transform_1(%arg0: i32) -> (i32, i32, i32) {
    %c0_i32 = arith.constant 0 : i32
    %c0_i32_0 = arith.constant 0 : i32
    %c0_i32_1 = arith.constant 0 : i32
    return %arg0, %c0_i32, %c0_i32_0 : i32, i32, i32
  }
}

</mosaic_0001>

<bundles_post_ra>
// kernel: tpu_custom_call.1
= control target key start
LH: loop header
LB: loop body
LE: loop exit
PB: predicated region body
PF: predicated region fallthrough
CT: control target
= control target key end

     0   :  { %6 = vsyncpa [#allocation3], 0  ;;  %s541_s0 = inlined_call_operand.hbm [shape: f32[2,4,256], index: 0, kind: input, shape index: {}]   ;;  %s542_s1 = inlined_call_operand.hbm [shape: f32[2,16,256], index: 1, kind: output, shape index: {}]  }
   0x1   :  { %8 = vsyncpa [#allocation3 + $0x1], 0 }
   0x2   :  { %9 = vsyncpa [#allocation4], 0 }
   0x3   :  { %11 = vsyncpa [#allocation4 + $0x1], 0  ;;  %s413_s6 = smov 0   ;;  %s415_s7 = smov 0  }
   0x4   :  { %s417_s8 = smov 0   ;;  %s419_s9 = smov 0  }
   0x5 LB: > { %s434_s10 = sadd.s32 4294967295, %s398_s9   ;;  %s237_s11 = sadd.s32 4294967294, %s398_s9   ;;  %s398_s9 = sphi %s419_s9, %s552_s9   ;;  %s394_s8 = sphi %s417_s8, %s551_s8   ;;  %s390_s7 = sphi %s415_s7, %s550_s7   ;;  %s386_s6 = sphi %s413_s6, %s549_s6  }
   0x6   : > { %s438_s12 = sadd.s32 1, %s398_s9   ;;  %s24_s13 = sadd.s32 1, %s394_s8 }
   0x7   : > { %s21_s14 = ssub.s32 %s398_s9, %s438_s12  ;;  %p31_p0 = scmp.ne.s32.totalorder %s394_s8, %s390_s7 }
   0x8   : > { %p22_p1 = scmp.eq.s32.totalorder %s21_s14, 0  ;;  %p32_p2 = scmp.eq.s32.totalorder %s398_s9, 0 }
   0x9   : > { %p37_p3 = scmp.ne.s32.totalorder %s390_s7, %s386_s6  ;;  %p38_p4 = scmp.eq.s32.totalorder %s434_s10, 0 }
   0xa   : > { %s450_s15 = scalar_select %p22_p1, %s394_s8, %s24_s13  }
   0xb   : > { %p452_p5 = por %p32_p2, %p31_p0  ;;  %p456_p6 = por %p38_p4, %p37_p3 }
   0xc   : > { %p61_p7 = scmp.eq.s32.totalorder %s434_s10, 1  ;;  %p67_p8 = scmp.eq.s32.totalorder %s237_s11, 1 }
   0xd   : > { %p265_p10 = scmp.lt.s32.totalorder %s398_s9, 2  ;;  %s87_s20 = sand.u32 1, %s394_s8  }
   0xe   : > { %p463_p11 = por %p61_p7, %p31_p0  ;;  %p467_p12 = por %p67_p8, %p37_p3 }
   0xf   : > { %s251_s21 = sshll.u32 %s398_s9, 3  ;;  %s240_s22 = sshll.u32 %s87_s20, 3 }
  0x10   : > { %s96_s25 = scalar_lea.hbm %s541_s0, %s251_s21  ;;  %s91_s27 = scalar_lea.vmem [#allocation2], %s240_s22 }
  0x11   : > { %s98_s26 = sshll.u32 %s96_s25, 4  ;;  %s100_s28 = sshll.u32 %s91_s27, 4  ;;  %s99_s26 = int_to_ptr.hbm [resolvable:$true] %s98_s26  ;;  %s101_s28 = int_to_ptr.vmem [resolvable:$true] %s100_s28 }
  0x12   : > { %p478_p13 = pnand %p265_p10, %p452_p5  ;;  %p243_p0 = scmp.ge.s32.totalorder %s398_s9, 1 }
  0x13   : > { %p105_p1 = scmp.lt.s32.totalorder %s398_s9, 3  ;;  %s88_s30 = scalar_lea.sflag [#allocation3], %s87_s20 }
  0x14   : > { %s302_s2 = sshra.s32 %s99_s26, 4  ;;  %p306_p3 = pneg %p478_p13  ;;  %s303_s2 = int_to_ptr.hbm [resolvable:$true] %s302_s2 }
  0x15   : > { %s304_s3 = scalar_lea.hbm %s303_s2, 8  ;;  %s309_s11 = scalar_lea.hbm %s541_s0, 16 }
  0x16   : > { %p305_p2 = scmp.ne.s32.totalorder %s303_s2, %s304_s3  ;;  %p310_p5 = scmp.lt.s32.totalorder %s303_s2, %s541_s0 }
  0x17   : > { %p311_p8 = scmp.lt.s32.totalorder %s309_s11, %s304_s3 }
  0x18   : > { %p307_p4 = pnand %p306_p3, %p305_p2 }
  0x19   : > { %p312_p10 = por %p311_p8, %p310_p5 }
  0x1a   : > { %p308_p7 = pneg %p307_p4 }
  0x1c   : > { %p313_p9 = pnand %p312_p10, %p308_p7 }
  0x1e   : > { %316 = shalt.err (!%p313_p9)
}
  0x1f   : > { %260 = dma.hbm_to_vmem [thread:$0]  (!%p478_p13), %s99_s26, 128, %s101_s28, %s88_s30  }
  0x20   : > { %p106_p2 = pnand %p243_p0, %p105_p1 }
  0x21   : > { %s499_s16 = sand.u32 (!%p106_p2), 1, %s390_s7  }
  0x22   : > { %109 = sbr.rel (%p106_p2) target bundleno = 56 (0x38), region = 24  ;;  %s244_s20 = sshll.u32 (!%p106_p2), %s499_s16, 3 }
  0x23   : > { %s112_s21 = scalar_lea.sflag (!%p106_p2), [#allocation3], %s499_s16  ;;  %s115_s22 = scalar_lea.vmem (!%p106_p2), [#allocation2], %s244_s20 }
  0x27   : > { %377 = dma.done.wait (%p456_p6), %s112_s21, 128  }
  0x28   : > { %379 = vsyncadd (%p456_p6), %s112_s21, 4294967168  ;;  %s245_s23 = sshll.u32 %s499_s16, 5  ;;  %v400_v0 = vmov 0.0   ;;  %s252_s25 = sshll.u32 %s434_s10, 5  ;;  %v135_v1 = vld [vmem:[%s115_s22] sm:$0xff] }
  0x29   : > { %s134_s24 = scalar_lea.vmem [#allocation5], %s245_s23  ;;  %137 = vst [vmem:[#allocation1] ss:$2 sm:$0xff] %v135_v1  ;;  %s160_s28 = scalar_lea.hbm %s542_s1, %s252_s25 }
  0x2a   : > { %144 = vst [vmem:[%s134_s24] sm:$0xf0] %v400_v0  ;;  %s161_s17 = sshll.u32 %s134_s24, 4  ;;  %s163_s29 = sshll.u32 %s160_s28, 4  ;;  %s162_s17 = int_to_ptr.vmem [resolvable:$true] %s161_s17  ;;  %s164_s29 = int_to_ptr.hbm [resolvable:$true] %s163_s29 }
  0x2b   : > { %145 = vst [vmem:[%s134_s24 + $0x8] sm:$0xf0] %v400_v0  ;;  %s149_s30 = scalar_lea.sflag [#allocation4], %s499_s16  ;;  %s346_s2 = sshra.s32 %s164_s29, 4  ;;  %s347_s2 = int_to_ptr.hbm [resolvable:$true] %s346_s2 }
  0x2c   : > { %146 = vst [vmem:[%s134_s24 + $0x10] sm:$0xff] %v400_v0  ;;  %s348_s3 = scalar_lea.hbm %s347_s2, 32  ;;  %s352_s5 = scalar_lea.hbm %s542_s1, 64 }
  0x2d   : > { %147 = vst [vmem:[%s134_s24 + $0x18] sm:$0xff] %v400_v0  ;;  %p349_p6 = scmp.ne.s32.totalorder %s347_s2, %s348_s3  ;;  %p353_p0 = scmp.lt.s32.totalorder %s347_s2, %s542_s1 }
  0x2e   : > { %p354_p1 = scmp.lt.s32.totalorder %s352_s5, %s348_s3 }
  0x2f   : > { %p350_p9 = pnand %p349_p6, %p463_p11 }
  0x30   : > { %v138_v2 = vld.sshfl [vmem:[#allocation1] sm:$0xff pattern:$0x75316420]  ;;  %v139_v3 = vld.sshfl [vmem:[#allocation1 + $0x8] sm:$0xff pattern:$0x75316420]  ;;  %p355_p3 = por %p354_p1, %p353_p0 }
  0x31   : > { %142 = vst [vmem:[%s134_s24] sm:$0xf] %v138_v2  ;;  %p351_p13 = pneg %p350_p9 }
  0x32   : > { %143 = vst [vmem:[%s134_s24 + $0x8] sm:$0xf] %v139_v3 }
  0x33   : > { %p356_p4 = pnand %p355_p3, %p351_p13 }
  0x35   : > { %359 = shalt.err (!%p356_p4)
}
  0x36   : > { %s401_s14 = smov 256   ;;  %s402_s16 = smov 16  }
  0x37   : > { %255 = dma.vmem_to_hbm [thread:$0]  (%p463_p11), %s162_s17, 512, %s164_s29, %s149_s30, %s401_s14, %s401_s14, %s402_s16  }
  0x38 PF: > { %s178_s20 = sand.u32 1, %s386_s6   ;;  %p548_p7 = scmp.ge.s32.totalorder %s398_s9, 2 }
  0x39   : > { %s179_s21 = scalar_lea.sflag [#allocation4], %s178_s20 }
  0x3a   : > { %p262_p5 = pnand %p548_p7, %p467_p12 }
  0x3c   : > { %p263_p8 = pneg %p262_p5 }
  0x3e   : > { %381 = dma.done.wait (%p263_p8), %s179_s21, 512  }
  0x3f   : > { %383 = vsyncadd (%p263_p8), %s179_s21, 4294966784  ;;  %p14_p10 = scmp.ge.s32.totalorder %s438_s12, 4   ;;  %s549_s6 = smov %s390_s7 }
  0x40   : > { %s550_s7 = smov %s394_s8  ;;  %s551_s8 = smov %s450_s15 }
  0x41   : > { %s552_s9 = smov %s438_s12  ;;  %16 = sbr.rel (!%p14_p10) target bundleno = 5 (0x5), region = 69 }
  0x46   :  { %185 = vsyncpa [#allocation3], 1 }
  0x47   :  { %187 = vsyncpa [#allocation3 + $0x1], 1 }
  0x48   :  { %188 = vsyncpa [#allocation4], 1 }
  0x49   :  { %190 = vsyncpa [#allocation4 + $0x1], 1 }

</bundles_post_ra>
